<compile_context>
chip_gen: v6e
topology: v6e:2x2x1
jax: 0.10.0
libtpu: 0.0.40
codegen_flags: <defaults>
</compile_context>

<pallas_src>
import jax
import jax.numpy as jnp
from jax import lax
from jax.experimental import pallas as pl
from jax.experimental.pallas import tpu as pltpu


def _head_kernel(x_ref, wqkv_ref, o_ref):
    # x_ref: (T, C) f32; wqkv_ref: (C, 3H) bf16; o_ref: (T, H) f32
    T, C = x_ref.shape
    H = o_ref.shape[1]
    scale = C ** -0.5  # scale by n_embd (C), matching the bigram source

    # Single fused projection matmul on the MXU: bf16 inputs, f32 accumulation.
    x = x_ref[...].astype(jnp.bfloat16)
    qkv = jnp.dot(x, wqkv_ref[...], preferred_element_type=jnp.float32)   # (T, 3H) f32

    # Fold the softmax scale into q (T,H) rather than wei (T,T).
    q = (qkv[:, 0 * H:1 * H] * scale).astype(jnp.bfloat16)
    k = qkv[:, 1 * H:2 * H].astype(jnp.bfloat16)
    v = qkv[:, 2 * H:3 * H].astype(jnp.bfloat16)

    # q @ k^T without an explicit transpose: contract the last dims of q and k.
    wei = lax.dot_general(
        q, k,
        dimension_numbers=(((1,), (1,)), ((), ())),
        preferred_element_type=jnp.float32,
    )                                                                     # (T, T) f32

    # Causal (lower-triangular) mask == masked_fill(tril[:T,:T] == 0, -inf)
    row = lax.broadcasted_iota(jnp.int32, (T, T), 0)
    col = lax.broadcasted_iota(jnp.int32, (T, T), 1)
    wei = jnp.where(col <= row, wei, -jnp.inf)

    # Numerically-stable softmax over the last axis (f32 on VPU/EUP, safe on all generations).
    wei = wei - jnp.max(wei, axis=-1, keepdims=True)
    p = jnp.exp(wei)
    p = p * pl.reciprocal(jnp.sum(p, axis=-1, keepdims=True), approx=True)

    o_ref[...] = jnp.dot(
        p.astype(jnp.bfloat16), v, preferred_element_type=jnp.float32,
    ).astype(o_ref.dtype)


def head_forward(x, wq, wk, wv):
    """x: (B, T, C) float32; wq/wk/wv: (C, H) float32 -> (B, T, H) float32."""
    B, T, C = x.shape
    H = wq.shape[1]
    # Fuse the three projections into one lane-dense weight; cast once to bf16 (tiny, one-off).
    wqkv = jnp.concatenate([wq, wk, wv], axis=1).astype(jnp.bfloat16)     # (C, 3H) bf16
    return pl.pallas_call(
        _head_kernel,
        out_shape=jax.ShapeDtypeStruct((B, T, H), jnp.float32),
        grid_spec=pltpu.PrefetchScalarGridSpec(
            num_scalar_prefetch=0,
            grid=(B,),
            in_specs=[
                pl.BlockSpec((None, T, C), lambda b: (b, 0, 0)),   # batch dim squeezed
                pl.BlockSpec((C, 3 * H), lambda b: (0, 0)),        # fused weight, stays resident
            ],
            out_specs=pl.BlockSpec((None, T, H), lambda b: (b, 0, 0)),
        ),
        compiler_params=pltpu.CompilerParams(
            dimension_semantics=("parallel",),
        ),
    )(x, wqkv)


def head_reference(x, wq, wk, wv):
    B, T, C = x.shape
    q = x @ wq
    k = x @ wk
    v = x @ wv
    wei = jnp.einsum("btd,bsd->bts", q, k) * (C ** -0.5)
    mask = jnp.tril(jnp.ones((T, T), dtype=bool))
    wei = jnp.where(mask[None, :, :], wei, -jnp.inf)
    wei = jax.nn.softmax(wei, axis=-1)
    return wei @ v


if __name__ == "__main__":
    # Module constants: n_embd = 384, block_size = 256 (T <= block_size). head_size = 64.
    B, T, C, H = 2, 128, 384, 64

    key = jax.random.PRNGKey(0)
    kx, kq, kk, kv = jax.random.split(key, 4)

    x = jax.random.normal(kx, (B, T, C), dtype=jnp.float32)
    # Deterministic synthetic weights (stand-in for nn.Linear(n_embd, head_size, bias=False))
    bound = 1.0 / (C ** 0.5)
    wq = jax.random.uniform(kq, (C, H), minval=-bound, maxval=bound, dtype=jnp.float32)
    wk = jax.random.uniform(kk, (C, H), minval=-bound, maxval=bound, dtype=jnp.float32)
    wv = jax.random.uniform(kv, (C, H), minval=-bound, maxval=bound, dtype=jnp.float32)

    out = head_forward(x, wq, wk, wv)
    out = jax.block_until_ready(out)

    ref = jax.block_until_ready(head_reference(x, wq, wk, wv))
    assert out.shape == (B, T, H)
    # bf16 MXU inputs (f32 accumulation) -> tolerance loosened vs the all-f32 reference.
    assert jnp.allclose(out, ref, atol=2e-2, rtol=2e-2), "mismatch vs JAX reference"

    print("KERNEL_OK")
</pallas_src>

<mosaic_0001>
module attributes {stable_mosaic.version = 11 : i64} {
  func.func @_head_kernel(%arg0: i32, %arg1: memref<1x128x384xf32, #tpu.memory_space<vmem>>, %arg2: memref<384x192xbf16, #tpu.memory_space<vmem>>, %arg3: memref<1x128x64xf32, #tpu.memory_space<vmem>>) attributes {dimension_semantics = [#tpu.dimension_semantics<parallel>], iteration_bounds = array<i64: 2>, scalar_prefetch = 0 : i64, scratch_operands = 0 : i64, tpu.core_type = #tpu.core_type<tc>, window_params = [{transform_indices = @transform_0, window_bounds = array<i64: 1, 128, 384>}, {pipeline_mode = #tpu.pipeline_mode<synchronous>, transform_indices = @transform_1, window_bounds = array<i64: 384, 192>}, {transform_indices = @transform_2, window_bounds = array<i64: 1, 128, 64>}]} {
    %c0 = arith.constant 0 : index
    %c0_0 = arith.constant 0 : index
    %c0_1 = arith.constant 0 : index
    %0 = vector.load %arg1[%c0, %c0_0, %c0_1] : memref<1x128x384xf32, #tpu.memory_space<vmem>>, vector<1x128x384xf32>
    %1 = vector.shape_cast %0 : vector<1x128x384xf32> to vector<128x384xf32>
    %2 = arith.truncf %1 : vector<128x384xf32> to vector<128x384xbf16>
    %c0_2 = arith.constant 0 : index
    %c0_3 = arith.constant 0 : index
    %3 = vector.load %arg2[%c0_2, %c0_3] : memref<384x192xbf16, #tpu.memory_space<vmem>>, vector<384x192xbf16>
    %cst = arith.constant dense<0.000000e+00> : vector<128x192xf32>
    %4 = tpu.matmul %2, %3, %cst {dimension_numbers = #tpu.dot_dimension_numbers<[1], [0], [0], [1], [0, 0, 1, 1], [], []>} : vector<128x384xbf16>, vector<384x192xbf16>, vector<128x192xf32> -> vector<128x192xf32>
    %5 = vector.extract_strided_slice %4 {offsets = [0, 0], sizes = [128, 64], strides = [1, 1]} : vector<128x192xf32> to vector<128x64xf32>
    %cst_4 = arith.constant 0.0510310382 : f32
    %6 = vector.broadcast %cst_4 : f32 to vector<128x64xf32>
    %7 = arith.mulf %5, %6 : vector<128x64xf32>
    %8 = arith.truncf %7 : vector<128x64xf32> to vector<128x64xbf16>
    %9 = vector.extract_strided_slice %4 {offsets = [0, 64], sizes = [128, 64], strides = [1, 1]} : vector<128x192xf32> to vector<128x64xf32>
    %10 = arith.truncf %9 : vector<128x64xf32> to vector<128x64xbf16>
    %11 = vector.extract_strided_slice %4 {offsets = [0, 128], sizes = [128, 64], strides = [1, 1]} : vector<128x192xf32> to vector<128x64xf32>
    %12 = arith.truncf %11 : vector<128x64xf32> to vector<128x64xbf16>
    %cst_5 = arith.constant dense<0.000000e+00> : vector<128x128xf32>
    %13 = tpu.matmul %8, %10, %cst_5 {dimension_numbers = #tpu.dot_dimension_numbers<[1], [1], [0], [0], [0, 0, 1, 0], [], []>} : vector<128x64xbf16>, vector<128x64xbf16>, vector<128x128xf32> -> vector<128x128xf32>
    %14 = tpu.iota {dimensions = array<i32: 0>} : vector<128x128xi32>
    %15 = tpu.iota {dimensions = array<i32: 1>} : vector<128x128xi32>
    %16 = arith.cmpi sle, %15, %14 : vector<128x128xi32>
    %cst_6 = arith.constant 0xFF800000 : f32
    %17 = vector.broadcast %cst_6 : f32 to vector<128x128xf32>
    %18 = arith.select %16, %13, %17 : vector<128x128xi1>, vector<128x128xf32>
    %cst_7 = arith.constant dense<0xFF800000> : vector<128xf32>
    %19 = vector.multi_reduction <maximumf>, %18, %cst_7 [1] : vector<128x128xf32> to vector<128xf32>
    %20 = vector.shape_cast %19 : vector<128xf32> to vector<128x1xf32>
    %21 = vector.broadcast %20 : vector<128x1xf32> to vector<128x128xf32>
    %22 = arith.subf %18, %21 : vector<128x128xf32>
    %23 = math.exp %22 : vector<128x128xf32>
    %cst_8 = arith.constant dense<0.000000e+00> : vector<128xf32>
    %24 = vector.multi_reduction <add>, %23, %cst_8 [1] : vector<128x128xf32> to vector<128xf32>
    %25 = vector.shape_cast %24 : vector<128xf32> to vector<128x1xf32>
    %26 = tpu.reciprocal %25 {approx = true} : vector<128x1xf32> -> vector<128x1xf32>
    %27 = vector.broadcast %26 : vector<128x1xf32> to vector<128x128xf32>
    %28 = arith.mulf %23, %27 : vector<128x128xf32>
    %29 = arith.truncf %28 : vector<128x128xf32> to vector<128x128xbf16>
    %cst_9 = arith.constant dense<0.000000e+00> : vector<128x64xf32>
    %30 = tpu.matmul %29, %12, %cst_9 {dimension_numbers = #tpu.dot_dimension_numbers<[1], [0], [0], [1], [0, 0, 1, 1], [], []>} : vector<128x128xbf16>, vector<128x64xbf16>, vector<128x64xf32> -> vector<128x64xf32>
    %c0_10 = arith.constant 0 : index
    %c0_11 = arith.constant 0 : index
    %c0_12 = arith.constant 0 : index
    %31 = vector.load %arg3[%c0_10, %c0_11, %c0_12] : memref<1x128x64xf32, #tpu.memory_space<vmem>>, vector<1x128x64xf32>
    %32 = vector.shape_cast %31 : vector<1x128x64xf32> to vector<128x64xf32>
    %33 = vector.shape_cast %30 : vector<128x64xf32> to vector<1x128x64xf32>
    tpu.vector_store %arg3[%c0_10, %c0_11, %c0_12], %33 {strides = array<i32>} : memref<1x128x64xf32, #tpu.memory_space<vmem>>, vector<1x128x64xf32>,
    return
  }
  func.func @transform_0(%arg0: i32) -> (i32, i32, i32) {
    %c0_i32 = arith.constant 0 : i32
    %c0_i32_0 = arith.constant 0 : i32
    %c0_i32_1 = arith.constant 0 : i32
    return %arg0, %c0_i32, %c0_i32_0 : i32, i32, i32
  }
  func.func @transform_1(%arg0: i32) -> (i32, i32) {
    %c0_i32 = arith.constant 0 : i32
    %c0_i32_0 = arith.constant 0 : i32
    %c0_i32_1 = arith.constant 0 : i32
    return %c0_i32, %c0_i32_0 : i32, i32
  }
  func.func @transform_2(%arg0: i32) -> (i32, i32, i32) {
    %c0_i32 = arith.constant 0 : i32
    %c0_i32_0 = arith.constant 0 : i32
    %c0_i32_1 = arith.constant 0 : i32
    return %arg0, %c0_i32, %c0_i32_0 : i32, i32, i32
  }
}

</mosaic_0001>

<bundles_post_ra>
// kernel: tpu_custom_call.1
= control target key start
LH: loop header
LB: loop body
LE: loop exit
PB: predicated region body
PF: predicated region fallthrough
CT: control target
= control target key end

     0   :  { %7 = vsyncpa [#allocation3], 0  ;;  %s2488_s0 = inlined_call_operand.hbm [shape: f32[2,128,384], index: 0, kind: input, shape index: {}]   ;;  %s2489_s1 = inlined_call_operand.vmem [shape: bf16[384,192], index: 1, kind: input, shape index: {}]   ;;  %s2490_s2 = inlined_call_operand.vmem [shape: f32[2,128,64], index: 2, kind: output, shape index: {}]  }
   0x1   :  { %9 = vsyncpa [#allocation3 + $0x1], 0  ;;  %s1796_s9 = smov 0   ;;  %s1798_s10 = smov 0  }
   0x2   :  { %s1800_s11 = smov 0   ;;  %s1802_s12 = smov 0  }
   0x3 LB: > { %s1815_s13 = sadd.s32 4294967295, %s1774_s12   ;;  %s1818_s14 = sadd.s32 1, %s1774_s12   ;;  %s1774_s12 = sphi %s1802_s12, %s2501_s12   ;;  %s1770_s11 = sphi %s1800_s11, %s2500_s11   ;;  %s1766_s10 = sphi %s1798_s10, %s2499_s10   ;;  %s1762_s9 = sphi %s1796_s9, %s2498_s9  }
   0x4   : > { %s19_s15 = ssub.s32 %s1774_s12, %s1818_s14  ;;  %s22_s16 = sadd.s32 1, %s1770_s11 }
   0x5   : > { %p20_p0 = scmp.eq.s32.totalorder %s19_s15, 0  ;;  %p29_p1 = scmp.ne.s32.totalorder %s1770_s11, %s1766_s10 }
   0x6   : > { %p30_p2 = scmp.eq.s32.totalorder %s1774_s12, 0  ;;  %p35_p3 = scmp.ne.s32.totalorder %s1766_s10, %s1762_s9 }
   0x7   : > { %s1828_s17 = scalar_select %p20_p0, %s1770_s11, %s22_s16  }
   0x8   : > { %p31_p4 = por %p30_p2, %p29_p1  ;;  %p36_p5 = scmp.eq.s32.totalorder %s1815_s13, 0 }
   0x9   : > { %p1539_p6 = scmp.lt.s32.totalorder %s1774_s12, 2  ;;  %s109_s19 = sand.u32 1, %s1770_s11  }
   0xa   : > { %p1832_p7 = por %p36_p5, %p35_p3  ;;  %s1530_s20 = smul.u32 384, %s109_s19 }
   0xb   : > { %s1531_s21 = smul.u32 6144, %s1774_s12  ;;  %p1838_p8 = pnand %p1539_p6, %p31_p4 }
   0xc   : > { %s2492_s18 = scalar_select %p1832_p7, 1, 0 }
   0xd   : > { %s1845_s25 = scalar_lea.hbm %s2488_s0, %s1531_s21  ;;  %s113_s26 = scalar_lea.vmem [#allocation2], %s1530_s20 }
   0xe   : > { %s120_s27 = sshll.u32 %s113_s26, 4  ;;  %s1850_s28 = scalar_lea.sflag [#allocation3], %s109_s19  ;;  %s1847_s27 = int_to_ptr.vmem [resolvable:$true] %s120_s27 }
   0xf   : > { %s1712_s29 = scalar_lea.hbm %s1845_s25, 6144  ;;  %p1714_p11 = pneg %p1838_p8 }
  0x10   : > { %p1713_p10 = scmp.ne.s32.totalorder %s1845_s25, %s1712_s29  ;;  %s1717_s4 = scalar_lea.hbm %s2488_s0, 12288 }
  0x11   : > { %p1718_p0 = scmp.lt.s32.totalorder %s1845_s25, %s2488_s0  ;;  %p1719_p1 = scmp.lt.s32.totalorder %s1717_s4, %s1712_s29 }
  0x12   : > { %p1715_p12 = pnand %p1714_p11, %p1713_p10 }
  0x13   : > { %p1720_p2 = por %p1719_p1, %p1718_p0 }
  0x14   : > { %p1716_p13 = pneg %p1715_p12 }
  0x16   : > { %p1721_p3 = pnand %p1720_p2, %p1716_p13 }
  0x18   : > { %1724 = shalt.err (!%p1721_p3)
}
  0x19   : > { %s1725_s7 = scalar_lea.vmem %s1847_s27, 6144  ;;  %s1776_s8 = smov [#allocation2]  }
  0x1a   : > { %p1726_p4 = scmp.ne.s32.totalorder %s1847_s27, %s1725_s7  ;;  %s1730_s9 = sshll.u32 %s1776_s8, 4  ;;  %s1731_s9 = int_to_ptr.vmem [resolvable:$false] %s1730_s9 }
  0x1b   : > { %s1732_s15 = scalar_lea.vmem %s1731_s9, 12288  ;;  %p1733_p10 = scmp.lt.s32.totalorder %s1847_s27, %s1731_s9 }
  0x1c   : > { %p1728_p5 = pnand %p1726_p4, %p1714_p11  ;;  %p1734_p12 = scmp.lt.s32.totalorder %s1732_s15, %s1725_s7 }
  0x1e   : > { %p1729_p6 = pneg %p1728_p5  ;;  %p1735_p9 = por %p1734_p12, %p1733_p10 }
  0x20   : > { %p1736_p7 = pnand %p1735_p9, %p1729_p6 }
  0x22   : > { %1739 = shalt.err (!%p1736_p7)
}
  0x23   : > { %s1777_s16 = smov 384   ;;  %s1778_s19 = smov 24  }
  0x24   : > { %1538 = dma.hbm_to_vmem [thread:$0]  (!%p1838_p8), %s1845_s25, 6144, %s1847_s27, %s1850_s28, %s1777_s16, %s1777_s16, %s1778_s19  }
  0x25   : > { %p128_p11 = scmp.lt.s32.totalorder %s1774_s12, 3  ;;  %p2494_p13 = scmp.ge.s32.totalorder %s1774_s12, 1 }
  0x27   : > { %p129_p0 = pnand %p2494_p13, %p128_p11 }
  0x28   : > { %s134_s20 = sand.u32 (!%p129_p0), 1, %s1766_s10   ;;  %p2495_p7 = scmp.ne.s32.totalorder (!%p129_p0), %s2492_s18, 0 }
  0x29   : > { %132 = sbr.rel (%p129_p0) target bundleno = 1293 (0x50d), region = 28  ;;  %s135_s23 = scalar_lea.sflag (!%p129_p0), [#allocation3], %s134_s20 }
  0x2a   : > { %s1532_s21 = smul.u32 (!%p129_p0), 384, %s134_s20 }
  0x2c   : > { %s1875_s24 = scalar_lea.vmem (!%p129_p0), [#allocation2], %s1532_s21 }
  0x2e   : > { %1757 = dma.done.wait (%p2495_p7), %s135_s23, 6144  }
  0x2f   : > { %1759 = vsyncadd (%p2495_p7), %s135_s23, 4294961152  ;;  %v1779_v0 = vmov 0   ;;  %v1576_v1 = vld [vmem:[%s2489_s1 + $0x74] ss:$8 sps:$4 sm:$0xff]   ;;  %v1578_v2 = vld [vmem:[%s2489_s1 + $0x70] ss:$8 sps:$4 sm:$0xff]  }
  0x30   : > { %670 = vmatprep.mubr.bf16.mxu1 %v1779_v0  ;;  %525 = vmatprep.subr.bf16.mxu0 %v1576_v1  ;;  %v1579_v3 = vld [vmem:[%s2489_s1 + $0x64] ss:$8 sps:$4 sm:$0xff]   ;;  %v1581_v4 = vld [vmem:[%s2489_s1 + $0x60] ss:$8 sps:$4 sm:$0xff]   ;;  %v1582_v5 = vld [vmem:[%s2489_s1 + $0x54] ss:$8 sps:$4 sm:$0xff]  }
  0x31   : > { %526 = vmatpush1.bf16.msra.mxu0 %v1578_v2  ;;  %v1584_v6 = vld [vmem:[%s2489_s1 + $0x50] ss:$8 sps:$4 sm:$0xff]   ;;  %v1585_v7 = vld [vmem:[%s2489_s1 + $0x44] ss:$8 sps:$4 sm:$0xff]   ;;  %v1597_v8 = vld [vmem:[%s2489_s1 + $0x174] ss:$8 sps:$4 sm:$0xff]  }
  0x32   : > { %527 = vmatprep.subr.bf16.mxu0 %v1579_v3  ;;  %v1599_v9 = vld [vmem:[%s2489_s1 + $0x170] ss:$8 sps:$4 sm:$0xff]   ;;  %v1587_v10 = vld [vmem:[%s2489_s1 + $0x40] ss:$8 sps:$4 sm:$0xff]   ;;  %v1588_v11 = vld [vmem:[%s2489_s1 + $0x34] ss:$8 sps:$4 sm:$0xff]   ;;  %638 = vmatprep.subr.bf16.mxu1 %v1597_v8 }
  0x33   : > { %v1603_v12 = vld [vmem:[%s2489_s1 + $0x164] ss:$8 sps:$4 sm:$0xff]   ;;  %639 = vmatpush1.bf16.msra.mxu1 %v1599_v9  ;;  %v1605_v13 = vld [vmem:[%s2489_s1 + $0x160] ss:$8 sps:$4 sm:$0xff]   ;;  %v1590_v14 = vld [vmem:[%s2489_s1 + $0x30] ss:$8 sps:$4 sm:$0xff]  }
  0x34   : > { %640 = vmatprep.subr.bf16.mxu1 %v1603_v12  ;;  %v1609_v15 = vld [vmem:[%s2489_s1 + $0x154] ss:$8 sps:$4 sm:$0xff]   ;;  %v1591_v16 = vld [vmem:[%s2489_s1 + $0x24] ss:$8 sps:$4 sm:$0xff]   ;;  %v1611_v17 = vld [vmem:[%s2489_s1 + $0x150] ss:$8 sps:$4 sm:$0xff]  }
  0x35   : > { %528 = vmatpush1.bf16.msra.mxu0 %v1581_v4  ;;  %v1615_v18 = vld [vmem:[%s2489_s1 + $0x144] ss:$8 sps:$4 sm:$0xff]   ;;  %v1593_v19 = vld [vmem:[%s2489_s1 + $0x20] ss:$8 sps:$4 sm:$0xff]   ;;  %v1594_v20 = vld [vmem:[%s2489_s1 + $0x14] ss:$8 sps:$4 sm:$0xff]  }
  0x36   : > { %529 = vmatprep.subr.bf16.mxu0 %v1582_v5  ;;  %v1617_v21 = vld [vmem:[%s2489_s1 + $0x140] ss:$8 sps:$4 sm:$0xff]   ;;  %v1621_v22 = vld [vmem:[%s2489_s1 + $0x134] ss:$8 sps:$4 sm:$0xff]   ;;  %v1596_v23 = vld [vmem:[%s2489_s1 + $0x10] ss:$8 sps:$4 sm:$0xff]  }
  0x37   : > { %641 = vmatpush1.bf16.msra.mxu1 %v1605_v13  ;;  %v1600_v24 = vld [vmem:[%s2489_s1 + $0x4] ss:$8 sps:$4 sm:$0xff]   ;;  %v1623_v25 = vld [vmem:[%s2489_s1 + $0x130] ss:$8 sps:$4 sm:$0xff]   ;;  %v1602_v27 = vld [vmem:[%s2489_s1] ss:$8 sps:$4 sm:$0xff]  }
  0x38   : > { %642 = vmatprep.subr.bf16.mxu1 %v1609_v15  ;;  %v1627_v26 = vld [vmem:[%s2489_s1 + $0x124] ss:$8 sps:$4 sm:$0xff]   ;;  %v1606_v28 = vld [vmem:[%s2489_s1 + $0xf4] ss:$8 sps:$4 sm:$0xff]   ;;  %v1629_v29 = vld [vmem:[%s2489_s1 + $0x120] ss:$8 sps:$4 sm:$0xff]  }
  0x39   : > { %530 = vmatpush1.bf16.msra.mxu0 %v1584_v6  ;;  %v1633_v30 = vld [vmem:[%s2489_s1 + $0x114] ss:$8 sps:$4 sm:$0xff]   ;;  %v1608_v31 = vld [vmem:[%s2489_s1 + $0xf0] ss:$8 sps:$4 sm:$0xff]   ;;  %v1612_v32 = vld [vmem:[%s2489_s1 + $0xe4] ss:$8 sps:$4 sm:$0xff]  }
  0x3a   : > { %531 = vmatprep.subr.bf16.mxu0 %v1585_v7  ;;  %v166_v33 = vld [vmem:[%s1875_s24 + $0x8] sm:$0xff]  ;;  %v1635_v34 = vld [vmem:[%s2489_s1 + $0x110] ss:$8 sps:$4 sm:$0xff]   ;;  %v169_v35 = vld [vmem:[%s1875_s24 + $0x20] sm:$0xff]  ;;  %vm815_vm0 = vcmask 523264   ;;  %p159_p8 = scmp.lt.s32.totalorder %s1815_s13, 1 }
  0x3b   : > { %643 = vmatpush1.bf16.msra.mxu1 %v1611_v17  ;;  %v1639_v36 = vld [vmem:[%s2489_s1 + $0x104] ss:$8 sps:$4 sm:$0xff]   ;;  %v214_v37 = vpack.c.bf16 %v169_v35, %v166_v33  ;;  %v1614_v38 = vld [vmem:[%s2489_s1 + $0xe0] ss:$8 sps:$4 sm:$0xff]   ;;  %v1618_v39 = vld [vmem:[%s2489_s1 + $0xd4] ss:$8 sps:$4 sm:$0xff]  }
  0x3c   : > { %644 = vmatprep.subr.bf16.mxu1 %v1615_v18  ;;  %v1641_v40 = vld [vmem:[%s2489_s1 + $0x100] ss:$8 sps:$4 sm:$0xff]   ;;  %v167_v41 = vld [vmem:[%s1875_s24 + $0x10] sm:$0xff]  ;;  %v1624_v44 = vld [vmem:[%s2489_s1 + $0xc4] ss:$8 sps:$4 sm:$0xff]   ;;  %s2503_s13 = smov (!%p159_p8, %s1815_s13), 1 }
  0x3d   : > { %532 = vmatpush1.bf16.msra.mxu0 %v1587_v10  ;;  %557 = vmatprep.mubr.bf16.mxu0 %v214_v37  ;;  %v170_v42 = vld [vmem:[%s1875_s24 + $0x28] sm:$0xff]  ;;  %v1620_v43 = vld [vmem:[%s2489_s1 + $0xd0] ss:$8 sps:$4 sm:$0xff]   ;;  %v1630_v47 = vld [vmem:[%s2489_s1 + $0xb4] ss:$8 sps:$4 sm:$0xff]   ;;  %s1409_s30 = sshll.u32 %s2503_s13, 7 }
  0x3e   : > { %533 = vmatprep.subr.bf16.mxu0 %v1588_v11  ;;  %v215_v45 = vpack.c.bf16 %v170_v42, %v167_v41  ;;  %v1626_v46 = vld [vmem:[%s2489_s1 + $0xc0] ss:$8 sps:$4 sm:$0xff]   ;;  %v176_v49 = vld [vmem:[%s1875_s24 + $0x58] sm:$0xff]  ;;  %v1636_v51 = vld [vmem:[%s2489_s1 + $0xa4] ss:$8 sps:$4 sm:$0xff]   ;;  %s2441_s5 = scalar_lea.vmem %s2490_s2, %s1409_s30 }
  0x3f   : > { %645 = vmatpush1.bf16.msra.mxu1 %v1617_v21  ;;  %v173_v48 = vld [vmem:[%s1875_s24 + $0x40] sm:$0xff]  ;;  %v1632_v50 = vld [vmem:[%s2489_s1 + $0xb0] ss:$8 sps:$4 sm:$0xff]   ;;  %v1642_v54 = vld [vmem:[%s2489_s1 + $0x94] ss:$8 sps:$4 sm:$0xff]  }
  0x40   : > { %646 = vmatprep.subr.bf16.mxu1 %v1621_v22  ;;  %v218_v52 = vpack.c.bf16 %v176_v49, %v173_v48  ;;  %v1638_v53 = vld [vmem:[%s2489_s1 + $0xa0] ss:$8 sps:$4 sm:$0xff]   ;;  %v179_v55 = vld [vmem:[%s1875_s24 + $0x70] sm:$0xff]  ;;  %v1645_v58 = vld [vmem:[%s2489_s1 + $0x84] ss:$8 sps:$4 sm:$0xff]  }
  0x41   : > { %534 = vmatpush1.bf16.msra.mxu0 %v1590_v14  ;;  %v182_v56 = vld [vmem:[%s1875_s24 + $0x88] sm:$0xff]  ;;  %v1644_v57 = vld [vmem:[%s2489_s1 + $0x90] ss:$8 sps:$4 sm:$0xff]   ;;  %v165_v61 = vld [vmem:[%s1875_s24] sm:$0xff] }
  0x42   : > { %535 = vmatprep.subr.bf16.mxu0 %v1591_v16  ;;  %v221_v59 = vpack.c.bf16 %v182_v56, %v179_v55  ;;  %v1647_v60 = vld [vmem:[%s2489_s1 + $0x80] ss:$8 sps:$4 sm:$0xff]   ;;  %v168_v62 = vld [vmem:[%s1875_s24 + $0x18] sm:$0xff]  ;;  %v175_v1 = vld [vmem:[%s1875_s24 + $0x50] sm:$0xff] }
  0x43   : > { %647 = vmatpush1.bf16.msra.mxu1 %v1623_v25  ;;  %v172_v63 = vld [vmem:[%s1875_s24 + $0x38] sm:$0xff]  ;;  %v185_v2 = vld [vmem:[%s1875_s24 + $0xa0] sm:$0xff]  ;;  %v213_v4 = vpack.c.bf16 %v168_v62, %v165_v61  ;;  %v171_v7 = vld [vmem:[%s1875_s24 + $0x30] sm:$0xff] }
  0x44   : > { %648 = vmatprep.subr.bf16.mxu1 %v1627_v26  ;;  %v188_v3 = vld [vmem:[%s1875_s24 + $0xb8] sm:$0xff]  ;;  %v217_v5 = vpack.c.bf16 %v175_v1, %v172_v63  ;;  %v174_v8 = vld [vmem:[%s1875_s24 + $0x48] sm:$0xff]  ;;  %v181_v10 = vld [vmem:[%s1875_s24 + $0x80] sm:$0xff] }
  0x45   : > { %536 = vmatpush1.bf16.msra.mxu0 %v1593_v19  ;;  %v224_v6 = vpack.c.bf16 %v188_v3, %v185_v2  ;;  %v178_v9 = vld [vmem:[%s1875_s24 + $0x68] sm:$0xff]  ;;  %v191_v11 = vld [vmem:[%s1875_s24 + $0xd0] sm:$0xff]  ;;  %v216_v13 = vpack.c.bf16 %v174_v8, %v171_v7  ;;  %v177_v16 = vld [vmem:[%s1875_s24 + $0x60] sm:$0xff] }
  0x46   : > { %537 = vmatprep.subr.bf16.mxu0 %v1594_v20  ;;  %v194_v12 = vld [vmem:[%s1875_s24 + $0xe8] sm:$0xff]  ;;  %v220_v14 = vpack.c.bf16 %v181_v10, %v178_v9  ;;  %v180_v17 = vld [vmem:[%s1875_s24 + $0x78] sm:$0xff]  ;;  %v187_v19 = vld [vmem:[%s1875_s24 + $0xb0] sm:$0xff] }
  0x47   : > { %649 = vmatpush1.bf16.msra.mxu1 %v1629_v29  ;;  %v227_v15 = vpack.c.bf16 %v194_v12, %v191_v11  ;;  %v184_v18 = vld [vmem:[%s1875_s24 + $0x98] sm:$0xff]  ;;  %v197_v20 = vld [vmem:[%s1875_s24 + $0x100] sm:$0xff]  ;;  %v219_v22 = vpack.c.bf16 %v180_v17, %v177_v16  ;;  %v183_v25 = vld [vmem:[%s1875_s24 + $0x90] sm:$0xff] }
  0x48   : > { %650 = vmatprep.subr.bf16.mxu1 %v1633_v30  ;;  %v200_v21 = vld [vmem:[%s1875_s24 + $0x118] sm:$0xff]  ;;  %v186_v26 = vld [vmem:[%s1875_s24 + $0xa8] sm:$0xff]  ;;  %v203_v29 = vld [vmem:[%s1875_s24 + $0x130] sm:$0xff] }
  0x49   : > { %538 = vmatpush1.bf16.msra.mxu0 %v1596_v23  ;;  %v223_v23 = vpack.c.bf16 %v187_v19, %v184_v18  ;;  %v206_v30 = vld [vmem:[%s1875_s24 + $0x148] sm:$0xff]  ;;  %v192_v35 = vld [vmem:[%s1875_s24 + $0xd8] sm:$0xff]  ;;  %v199_v37 = vld [vmem:[%s1875_s24 + $0x110] sm:$0xff] }
  0x4a   : > { %539 = vmatprep.subr.bf16.mxu0 %v1600_v24  ;;  %v230_v24 = vpack.c.bf16 %v200_v21, %v197_v20  ;;  %v233_v33 = vpack.c.bf16 %v206_v30, %v203_v29  ;;  %v201_v48 = vld [vmem:[%s1875_s24 + $0x120] sm:$0xff]  ;;  %v204_v49 = vld [vmem:[%s1875_s24 + $0x138] sm:$0xff]  ;;  %v210_v55 = vld [vmem:[%s1875_s24 + $0x168] sm:$0xff] }
  0x4b   : > { %651 = vmatpush1.bf16.msra.mxu1 %v1635_v34  ;;  %v189_v34 = vld [vmem:[%s1875_s24 + $0xc0] sm:$0xff] }
  0x4c   : > { %652 = vmatprep.subr.bf16.mxu1 %v1639_v36  ;;  %v196_v36 = vld [vmem:[%s1875_s24 + $0xf8] sm:$0xff] }
  0x4d   : > { %540 = vmatpush1.bf16.msra.mxu0 %v1602_v27  ;;  %v190_v27 = vld [vmem:[%s1875_s24 + $0xc8] sm:$0xff]  ;;  %v229_v41 = vpack.c.bf16 %v199_v37, %v196_v36 }
  0x4e   : > { %541 = vmatprep.subr.bf16.mxu0 %v1606_v28  ;;  %v193_v28 = vld [vmem:[%s1875_s24 + $0xe0] sm:$0xff] }
  0x4f   : > { %653 = vmatpush1.bf16.msra.mxu1 %v1641_v40  ;;  %v225_v40 = vpack.c.bf16 %v192_v35, %v189_v34 }
  0x51   : > { %542 = vmatpush2.bf16.msra.mxu0 %v1608_v31  ;;  %v222_v31 = vpack.c.bf16 %v186_v26, %v183_v25 }
  0x52   : > { %543 = vmatprep.subr.bf16.mxu0 %v1612_v32  ;;  %671 = vmatmul.mubr.bf16.vlgmr.msra.gmra.mxu1 %v215_v45  ;;  %v226_v32 = vpack.c.bf16 %v193_v28, %v190_v27  ;;  %v202_v45 = vld [vmem:[%s1875_s24 + $0x128] sm:$0xff] }
  0x53   : > { %680 = vmatprep.mubr.bf16.mxu1 %v1779_v0 }
  0x55   : > { %544 = vmatpush2.bf16.msra.mxu0 %v1614_v38  ;;  %v209_v38 = vld [vmem:[%s1875_s24 + $0x160] sm:$0xff] }
  0x56   : > { %545 = vmatprep.subr.bf16.mxu0 %v1618_v39  ;;  %v212_v39 = vld [vmem:[%s1875_s24 + $0x178] sm:$0xff] }
  0x57   : > { %v236_v42 = vpack.c.bf16 %v212_v39, %v209_v38 }
  0x59   : > { %546 = vmatpush2.bf16.msra.mxu0 %v1620_v43  ;;  %v195_v43 = vld [vmem:[%s1875_s24 + $0xf0] sm:$0xff] }
  0x5a   : > { %547 = vmatprep.subr.bf16.mxu0 %v1624_v44  ;;  %681 = vmatmul.mubr.bf16.gmra.mxu1 %v218_v52  ;;  %v198_v44 = vld [vmem:[%s1875_s24 + $0x108] sm:$0xff]  ;;  %v231_v52 = vpack.c.bf16 %v204_v49, %v201_v48 }
  0x5b   : > { %690 = vmatprep.mubr.bf16.mxu1 %v1779_v0 }
  0x5d   : > { %548 = vmatpush2.bf16.msra.mxu0 %v1626_v46  ;;  %v205_v46 = vld [vmem:[%s1875_s24 + $0x140] sm:$0xff] }
  0x5e   : > { %549 = vmatprep.subr.bf16.mxu0 %v1630_v47  ;;  %v228_v47 = vpack.c.bf16 %v198_v44, %v195_v43 }
  0x61   : > { %550 = vmatpush2.bf16.msra.mxu0 %v1632_v50  ;;  %v208_v50 = vld [vmem:[%s1875_s24 + $0x158] sm:$0xff] }
  0x62   : > { %551 = vmatprep.subr.bf16.mxu0 %v1636_v51  ;;  %691 = vmatmul.mubr.bf16.gmra.mxu1 %v221_v59  ;;  %v211_v51 = vld [vmem:[%s1875_s24 + $0x170] sm:$0xff] }
  0x63   : > { %700 = vmatprep.mubr.bf16.mxu1 %v1779_v0 }
  0x65   : > { %552 = vmatpush2.bf16.msra.mxu0 %v1638_v53  ;;  %v235_v53 = vpack.c.bf16 %v211_v51, %v208_v50 }
  0x66   : > { %553 = vmatprep.subr.bf16.mxu0 %v1642_v54  ;;  %v207_v54 = vld [vmem:[%s1875_s24 + $0x150] sm:$0xff]  ;;  %s1780_s24 = smov 64  }
  0x67   : > { %v234_v56 = vpack.c.bf16 %v210_v55, %v207_v54 }
  0x69   : > { %554 = vmatpush2.bf16.msra.mxu0 %v1644_v57 }
  0x6a   : > { %555 = vmatprep.subr.bf16.mxu0 %v1645_v58  ;;  %701 = vmatmul.mubr.bf16.gmra.mxu1 %v224_v6 }
  0x6b   : > { %710 = vmatprep.mubr.bf16.mxu1 %v1779_v0 }
  0x6d   : > { %556 = vmatpush2.bf16.msra.mxu0 %v1647_v60 }
  0x70   : > { %558 = vmatmul.mubr.bf16.vlgmr.msra.gmra.mxu0 %v213_v4 }
  0x71   : > { %567 = vmatprep.mubr.bf16.mxu0 %v217_v5 }
  0x72   : > { %711 = vmatmul.mubr.bf16.gmra.mxu1 %v227_v15 }
  0x73   : > { %720 = vmatprep.mubr.bf16.mxu1 %v1779_v0 }
  0x78   : > { %568 = vmatmul.mubr.bf16.gmra.mxu0 %v216_v13 }
  0x79   : > { %577 = vmatprep.mubr.bf16.mxu0 %v220_v14 }
  0x7a   : > { %721 = vmatmul.mubr.bf16.gmra.mxu1 %v230_v24 }
  0x7b   : > { %730 = vmatprep.mubr.bf16.mxu1 %v1779_v0 }
  0x80   : > { %578 = vmatmul.mubr.bf16.gmra.mxu0 %v219_v22 }
  0x81   : > { %587 = vmatprep.mubr.bf16.mxu0 %v223_v23 }
  0x82   : > { %731 = vmatmul.mubr.bf16.gmra.mxu1 %v233_v33 }
  0x83   : > { %740 = vmatprep.mubr.bf16.mxu1 %v1779_v0  ;;  %v232_v0 = vpack.c.bf16 %v205_v46, %v202_v45 }
  0x88   : > { %588 = vmatmul.mubr.bf16.gmra.mxu0 %v222_v31 }
  0x89   : > { %597 = vmatprep.mubr.bf16.mxu0 %v226_v32 }
  0x8a   : > { %741 = vmatmul.mubr.bf16.gmra.mxu1 %v236_v42 }
  0x90   : > { %598 = vmatmul.mubr.bf16.gmra.mxu0 %v225_v40 }
  0x91   : > { %607 = vmatprep.mubr.bf16.mxu0 %v229_v41 }
  0x98   : > { %608 = vmatmul.mubr.bf16.gmra.mxu0 %v228_v47 }
  0x99   : > { %617 = vmatprep.mubr.bf16.mxu0 %v232_v0 }
  0xa0   : > { %618 = vmatmul.mubr.bf16.gmra.mxu0 %v231_v52 }
  0xa1   : > { %627 = vmatprep.mubr.bf16.mxu0 %v235_v53 }
  0xa8   : > { %628 = vmatmul.mubr.bf16.gmra.mxu0 %v234_v56 }
 0x112   : > { %v672_v57 = vpop.f32.mrf.mxu1 }
 0x114   : > { %v674_v58 = vpop.f32.mrf.mxu1 }
 0x116   : > { %v676_v59 = vpop.f32.mrf.mxu1 }
 0x118   : > { %v678_v60 = vpop.f32.mrf.mxu1 }
 0x11a   : > { %v682_v61 = vpop.f32.mrf.mxu1 }
 0x11c   : > { %v684_v62 = vpop.f32.mrf.mxu1 }
 0x11e   : > { %v686_v63 = vpop.f32.mrf.mxu1 }
 0x120   : > { %v688_v1 = vpop.f32.mrf.mxu1 }
 0x122   : > { %v692_v2 = vpop.f32.mrf.mxu1 }
 0x124   : > { %v2081_v3 = vpop.f32.mrf.mxu1 }
 0x126   : > { %v696_v4 = vpop.f32.mrf.mxu1 }
 0x128   : > { %v2083_v6 = vpop.f32.mrf.mxu1 }
 0x12a   : > { %v702_v8 = vpop.f32.mrf.mxu1 }
 0x12c   : > { %v2087_v12 = vpop.f32.mrf.mxu1 }
 0x12e   : > { %v706_v15 = vpop.f32.mrf.mxu1 }
 0x130   : > { %v559_v5 = vpop.f32.mrf.mxu0  ;;  %v2093_v20 = vpop.f32.mrf.mxu1 }
 0x131   : > { %v2085_v9 = vadd.f32 %v672_v57, %v559_v5 }
 0x132   : > { %v561_v7 = vpop.f32.mrf.mxu0  ;;  %v712_v25 = vpop.f32.mrf.mxu1 }
 0x133   : > { %v675_v10 = vadd.f32 %v674_v58, %v561_v7  ;;  %v751_v16 = vmul.f32 0.05103104, %v2085_v9 }
 0x134   : > { %v563_v11 = vpop.f32.mrf.mxu0  ;;  %v2100_v28 = vpop.f32.mrf.mxu1 }
 0x135   : > { %v2089_v13 = vadd.f32 %v676_v59, %v563_v11 }
 0x136   : > { %v565_v14 = vpop.f32.mrf.mxu0  ;;  %v716_v31 = vpop.f32.mrf.mxu1 }
 0x137   : > { %v752_v17 = vmul.f32 0.05103104, %v2089_v13  ;;  %v679_v18 = vadd.f32 %v678_v60, %v565_v14 }
 0x138   : > { %v569_v19 = vpop.f32.mrf.mxu0  ;;  %v2110_v36 = vpop.f32.mrf.mxu1 }
 0x139   : > { %v767_v21 = vpack.c.bf16 %v752_v17, %v751_v16  ;;  %v2095_v22 = vpack.c.bf16 %v679_v18, %v675_v10  ;;  %v2097_v23 = vadd.f32 %v682_v61, %v569_v19 }
 0x13a   : > { %v571_v24 = vpop.f32.mrf.mxu0  ;;  %v722_v40 = vpop.f32.mrf.mxu1 }
 0x13b   : > { %v685_v26 = vadd.f32 %v684_v62, %v571_v24  ;;  %1458 = vmatprep.mubr.msk.bf16.mxu1 %vm815_vm0, %v767_v21  ;;  %v2105_v32 = vmul.f32 0.05103104, %v2097_v23 }
 0x13c   : > { %v573_v27 = vpop.f32.mrf.mxu0  ;;  %v2120_v45 = vpop.f32.mrf.mxu1 }
 0x13d   : > { %v2102_v29 = vadd.f32 %v686_v63, %v573_v27 }
 0x13e   : > { %v575_v30 = vpop.f32.mrf.mxu0  ;;  %v726_v50 = vpop.f32.mrf.mxu1 }
 0x13f   : > { %v2108_v33 = vmul.f32 0.05103104, %v2102_v29  ;;  %v689_v34 = vadd.f32 %v688_v1, %v575_v30 }
 0x140   : > { %v579_v35 = vpop.f32.mrf.mxu0  ;;  %v2136_v55 = vpop.f32.mrf.mxu1 }
 0x141   : > { %v768_v37 = vpack.c.bf16 %v2108_v33, %v2105_v32  ;;  %v2114_v38 = vpack.c.bf16 %v689_v34, %v685_v26  ;;  %v693_v41 = vadd.f32 %v692_v2, %v579_v35 }
 0x142   : > { %v2116_v39 = vpop.f32.mrf.mxu0  ;;  %v732_v61 = vpop.f32.mrf.mxu1 }
 0x143   : > { %v2122_v46 = vmul.f32 0.05103104, %v693_v41 }
 0x144   : > { %v583_v42 = vpop.f32.mrf.mxu0 }
 0x145   : > { %v697_v43 = vadd.f32 %v696_v4, %v583_v42  ;;  %v734_v4 = vpop.f32.mrf.mxu1 }
 0x146   : > { %v2118_v44 = vpop.f32.mrf.mxu0 }
 0x147   : > { %v2124_v47 = vmul.f32 0.05103104, %v697_v43  ;;  %v736_v14 = vpop.f32.mrf.mxu1 }
 0x148   : > { %v589_v0 = vpop.f32.mrf.mxu0 }
 0x149   : > { %v769_v48 = vpack.c.bf16 %v2124_v47, %v2122_v46  ;;  %v2130_v51 = vadd.f32 %v702_v8, %v589_v0  ;;  %v738_v19 = vpop.f32.mrf.mxu1 }
 0x14a   : > { %v2128_v49 = vpop.f32.mrf.mxu0 }
 0x14b   : > { %v2139_v56 = vmul.f32 0.05103104, %v2130_v51 }
 0x14c   : > { %v593_v52 = vpop.f32.mrf.mxu0 }
 0x14d   : > { %v2132_v53 = vadd.f32 %v706_v15, %v593_v52  ;;  %v777_v52 = vpack.c.bf16 %v697_v43, %v693_v41 }
 0x14e   : > { %v2134_v54 = vpop.f32.mrf.mxu0 }
 0x14f   : > { %v2142_v57 = vmul.f32 0.05103104, %v2132_v53 }
 0x150   : > { %v599_v58 = vpop.f32.mrf.mxu0 }
 0x151   : > { %v770_v59 = vpack.c.bf16 %v2142_v57, %v2139_v56  ;;  %v713_v62 = vadd.f32 %v712_v25, %v599_v58 }
 0x152   : > { %v2146_v60 = vpop.f32.mrf.mxu0 }
 0x153   : > { %v2150_v5 = vmul.f32 0.05103104, %v713_v62 }
 0x154   : > { %v603_v63 = vpop.f32.mrf.mxu0 }
 0x155   : > { %v717_v1 = vadd.f32 %v716_v31, %v603_v63  ;;  %v742_v31 = vpop.f32.mrf.mxu1 }
 0x156   : > { %v2148_v2 = vpop.f32.mrf.mxu0 }
 0x157   : > { %v2152_v7 = vmul.f32 0.05103104, %v717_v1  ;;  %v779_v34 = vpack.c.bf16 %v717_v1, %v713_v62  ;;  %v744_v0 = vpop.f32.mrf.mxu1  ;;  %v775_v1 = vpack.c.bf16 %v2089_v13, %v2085_v9 }
 0x158   : > { %v609_v8 = vpop.f32.mrf.mxu0 }
 0x159   : > { %v771_v10 = vpack.c.bf16 %v2152_v7, %v2150_v5  ;;  %v723_v15 = vadd.f32 %v722_v40, %v609_v8 }
 0x15a   : > { %v611_v11 = vpop.f32.mrf.mxu0 }
 0x15b   : > { %v2156_v21 = vmul.f32 0.05103104, %v723_v15 }
 0x15c   : > { %v613_v16 = vpop.f32.mrf.mxu0 }
 0x15d   : > { %v727_v17 = vadd.f32 %v726_v50, %v613_v16  ;;  %v746_v16 = vpop.f32.mrf.mxu1 }
 0x15e   : > { %v615_v18 = vpop.f32.mrf.mxu0 }
 0x15f   : > { %v2158_v24 = vmul.f32 0.05103104, %v727_v17  ;;  %v780_v25 = vpack.c.bf16 %v727_v17, %v723_v15  ;;  %v729_v9 = vadd.f32 %v2136_v55, %v615_v18  ;;  %v715_v18 = vadd.f32 %v2100_v28, %v2146_v60 }
 0x160   : > { %v619_v26 = vpop.f32.mrf.mxu0  ;;  %v699_v28 = vadd.f32 %v2083_v6, %v2118_v44 }
 0x161   : > { %809 = vrot.lane.b32.xlu1 %v780_v25, %s1780_s24  ;;  %v733_v35 = vadd.f32 %v732_v61, %v619_v26  ;;  %v748_v25 = vpop.f32.mrf.mxu1  ;;  %v2496_v32 = vpack.c.bf16 %v2158_v24, %v2156_v21 }
 0x162   : > { %v621_v30 = vpop.f32.mrf.mxu0 }
 0x163   : > { %v2164_v58 = vmul.f32 0.05103104, %v733_v35  ;;  %v735_v27 = vadd.f32 %v734_v4, %v621_v30  ;;  %v778_v4 = vpack.c.bf16 %v2132_v53, %v2130_v51  ;;  %v719_v30 = vadd.f32 %v2110_v36, %v2148_v2 }
 0x164   : > { %v623_v40 = vpop.f32.mrf.mxu0  ;;  %v709_v51 = vadd.f32 %v2093_v20, %v2134_v54  ;;  %v705_v36 = vadd.f32 %v2087_v12, %v2128_v49 }
 0x165   : > { %v737_v42 = vadd.f32 %v736_v14, %v623_v40  ;;  %807 = vrot.lane.b32.xlu1 %v779_v34, %s1780_s24  ;;  %v787_v53 = vpack.c.bf16 %v719_v30, %v715_v18 }
 0x166   : > { %v625_v50 = vpop.f32.mrf.mxu0  ;;  %v786_v60 = vpack.c.bf16 %v709_v51, %v705_v36 }
 0x167   : > { %v2166_v63 = vmul.f32 0.05103104, %v737_v42  ;;  %v739_v41 = vadd.f32 %v738_v19, %v625_v50  ;;  %v781_v13 = vpack.c.bf16 %v737_v42, %v733_v35 }
 0x168   : > { %v629_v8 = vpop.f32.mrf.mxu0 }
 0x169   : > { %803 = vrot.lane.b32.xlu1 %v777_v52, %s1780_s24  ;;  %v743_v62 = vadd.f32 %v742_v31, %v629_v8  ;;  %v2184_v19 = vpack.c.bf16 %v739_v41, %v735_v27  ;;  %v2497_v33 = vpack.c.bf16 %v2166_v63, %v2164_v58 }
 0x16a   : > { %v631_v61 = vpop.f32.mrf.mxu0 }
 0x16b   : > { %v2174_v43 = vmul.f32 0.05103104, %v743_v62  ;;  %v745_v34 = vadd.f32 %v744_v0, %v631_v61  ;;  %v725_v0 = vadd.f32 %v2120_v45, %v611_v11  ;;  %v776_v45 = vpack.c.bf16 %v2102_v29, %v2097_v23 }
 0x16c   : > { %v633_v14 = vpop.f32.mrf.mxu0  ;;  %v695_v23 = vadd.f32 %v2081_v3, %v2116_v39 }
 0x16d   : > { %v747_v17 = vadd.f32 %v746_v16, %v633_v14  ;;  %799 = vrot.lane.b32.xlu1 %v775_v1, %s1780_s24  ;;  %v2195_v55 = vpack.c.bf16 %v729_v9, %v725_v0 }
 0x16e   : > { %v635_v26 = vpop.f32.mrf.mxu0  ;;  %v785_v29 = vpack.c.bf16 %v699_v28, %v695_v23 }
 0x16f   : > { %v2176_v40 = vmul.f32 0.05103104, %v747_v17  ;;  %v749_v15 = vadd.f32 %v748_v25, %v635_v26  ;;  %v782_v52 = vpack.c.bf16 %v747_v17, %v743_v62 }
 0x171   : > { %v774_v31 = vpack.c.bf16 %v2176_v40, %v2174_v43  ;;  %v2180_v8 = vpack.c.bf16 %v749_v15, %v745_v34  ;;  %813 = vrot.lane.b32.xlu0 %v782_v52, %s1780_s24 }
 0x173   : > { %1474 = vmatprep.subr.bf16.mxu0 %v2180_v8 }
 0x174   : > { %1475 = vmatpush3.bf16.msra.mxu0 %v2180_v8 }
 0x175   : > { %811 = vrot.lane.b32.xlu0 %v781_v13, %s1780_s24  ;;  %1476 = vmatprep.subr.bf16.mxu0 %v2184_v19 }
 0x178   : > { %1477 = vmatpush3.bf16.msra.mxu0 %v2184_v19 }
 0x179   : > { %805 = vrot.lane.b32.xlu0 %v778_v4, %s1780_s24  ;;  %1478 = vmatprep.subr.bf16.mxu0 %v2195_v55 }
 0x17c   : > { %1479 = vmatpush3.bf16.msra.mxu0 %v2195_v55 }
 0x17d   : > { %801 = vrot.lane.b32.xlu0 %v776_v45, %s1780_s24  ;;  %1480 = vmatprep.subr.bf16.mxu0 %v787_v53 }
 0x180   : > { %1481 = vmatpush3.bf16.msra.mxu0 %v787_v53 }
 0x181   : > { %1482 = vmatprep.subr.bf16.mxu0 %v786_v60 }
 0x184   : > { %1483 = vmatpush3.bf16.msra.mxu0 %v786_v60 }
 0x185   : > { %1484 = vmatprep.subr.bf16.mxu0 %v785_v29 }
 0x188   : > { %1485 = vmatpush3.bf16.msra.mxu0 %v785_v29 }
 0x189   : > { %1486 = vmatprep.subr.bf16.mxu0 %v2114_v38 }
 0x18c   : > { %1487 = vmatpush3.bf16.msra.mxu0 %v2114_v38 }
 0x18d   : > { %1488 = vmatprep.subr.bf16.mxu0 %v2095_v22 }
 0x190   : > { %1489 = vmatpush3.bf16.msra.mxu0 %v2095_v22 }
 0x1d3   : > { %v810_v39 = vpop.permute.xlu1 %809 }
 0x1d4   : > { %v856_v44 = vsel %vm815_vm0, %v810_v39, 0 }
 0x1d7   : > { %v808_v49 = vpop.permute.xlu1 %807 }
 0x1d8   : > { %v853_v54 = vsel %vm815_vm0, %v808_v49, 0 }
 0x1db   : > { %v804_v27 = vpop.permute.xlu1 %803 }
 0x1dc   : > { %v847_v35 = vsel %vm815_vm0, %v804_v27, 0 }
 0x1df   : > { %v800_v15 = vpop.permute.xlu1 %799 }
 0x1e0   : > { %v841_v16 = vsel %vm815_vm0, %v800_v15, 0 }
 0x1e3   : > { %v814_v12 = vpop.permute.xlu0 %813 }
 0x1e4   : > { %v862_v6 = vsel %vm815_vm0, %v814_v12, 0  ;;  %1522 = vmatprep.subr.msk.bf16.mxu1 %vm815_vm0, %v814_v12 }
 0x1e5   : > { %1443 = vmatpush3.bf16.xpose.msra.mxu1 %v862_v6 }
 0x1e7   : > { %v812_v3 = vpop.permute.xlu0 %811 }
 0x1e8   : > { %1523 = vmatprep.subr.msk.bf16.mxu1 %vm815_vm0, %v812_v3  ;;  %v859_v20 = vsel %vm815_vm0, %v812_v3, 0 }
 0x1eb   : > { %v806_v2 = vpop.permute.xlu0 %805 }
 0x1ec   : > { %v850_v11 = vsel %vm815_vm0, %v806_v2, 0 }
 0x1ed   : > { %1445 = vmatpush3.bf16.xpose.msra.mxu1 %v859_v20 }
 0x1ee   : > { %1524 = vmatprep.subr.msk.bf16.mxu1 %vm815_vm0, %v810_v39 }
 0x1ef   : > { %v802_v42 = vpop.permute.xlu0 %801 }
 0x1f0   : > { %v844_v50 = vsel %vm815_vm0, %v802_v42, 0 }
 0x1f5   : > { %1447 = vmatpush3.bf16.xpose.msra.mxu1 %v856_v44 }
 0x1f6   : > { %1525 = vmatprep.subr.msk.bf16.mxu1 %vm815_vm0, %v808_v49 }
 0x1fd   : > { %1449 = vmatpush3.bf16.xpose.msra.mxu1 %v853_v54 }
 0x1fe   : > { %1526 = vmatprep.subr.msk.bf16.mxu1 %vm815_vm0, %v806_v2 }
 0x205   : > { %1451 = vmatpush3.bf16.xpose.msra.mxu1 %v850_v11 }
 0x206   : > { %1527 = vmatprep.subr.msk.bf16.mxu1 %vm815_vm0, %v804_v27 }
 0x20d   : > { %1453 = vmatpush3.bf16.xpose.msra.mxu1 %v847_v35 }
 0x20e   : > { %1528 = vmatprep.subr.msk.bf16.mxu1 %vm815_vm0, %v802_v42 }
 0x215   : > { %1455 = vmatpush3.bf16.xpose.msra.mxu1 %v844_v50 }
 0x216   : > { %1529 = vmatprep.subr.msk.bf16.mxu1 %vm815_vm0, %v800_v15 }
 0x21d   : > { %1457 = vmatpush3.bf16.xpose.msra.mxu1 %v841_v16 }
 0x21e   : > { %1506 = vmatprep.subr.bf16.mxu1 %v2180_v8 }
 0x224   : > { %1459 = vmatmul.mubr.msk.bf16.vlgmr.msra.gmra.mxu1 %vm815_vm0, %v768_v37  ;;  %v961_v37 = vlaneseq }
 0x225   : > { %1462 = vmatprep.mubr.msk.bf16.mxu1 %vm815_vm0, %v769_v48  ;;  %1514 = vmatpush3.bf16.msra.mxu1 %v2180_v8 }
 0x226   : > { %1507 = vmatprep.subr.bf16.mxu1 %v2184_v19  ;;  %v2272_v46 = vshrl.u32 %v961_v37, 7  ;;  %v2275_v48 = vand.u32 127, %v961_v37 }
 0x228   : > { %v964_v47 = vadd.s32 16, %v2272_v46  ;;  %vm980_vm2 = vcmp.le.s32.totalorder %v2275_v48, %v2272_v46  ;;  %v965_v57 = vadd.s32 24, %v2272_v46  ;;  %v966_v62 = vadd.s32 32, %v2272_v46 }
 0x229   : > { %1515 = vmatpush3.bf16.msra.mxu1 %v2184_v19  ;;  %v967_v61 = vadd.s32 40, %v2272_v46  ;;  %v972_v41 = vadd.s32 80, %v2272_v46  ;;  %v970_v43 = vadd.s32 64, %v2272_v46  ;;  %v973_v52 = vadd.s32 88, %v2272_v46 }
 0x22a   : > { %1508 = vmatprep.subr.bf16.mxu1 %v2195_v55  ;;  %vm982_vm1 = vcmp.le.s32.totalorder %v2275_v48, %v964_v47  ;;  %vm983_vm3 = vcmp.le.s32.totalorder %v2275_v48, %v965_v57  ;;  %vm984_vm6 = vcmp.le.s32.totalorder %v2275_v48, %v966_v62  ;;  %v971_v19 = vadd.s32 72, %v2272_v46 }
 0x22b   : > { %vm985_vm7 = vcmp.le.s32.totalorder %v2275_v48, %v967_v61  ;;  %vm990_vm8 = vcmp.le.s32.totalorder %v2275_v48, %v972_v41  ;;  %vm988_vm9 = vcmp.le.s32.totalorder %v2275_v48, %v970_v43  ;;  %vm991_vm10 = vcmp.le.s32.totalorder %v2275_v48, %v973_v52 }
 0x22c   : > { %1463 = vmatmul.mubr.msk.bf16.gmra.mxu1 %vm815_vm0, %v770_v59  ;;  %v974_v0 = vadd.s32 96, %v2272_v46  ;;  %vm989_vm11 = vcmp.le.s32.totalorder %v2275_v48, %v971_v19  ;;  %v969_v18 = vadd.s32 56, %v2272_v46  ;;  %v976_v45 = vadd.s32 112, %v2272_v46 }
 0x22d   : > { %1466 = vmatprep.mubr.msk.bf16.mxu1 %vm815_vm0, %v771_v10  ;;  %1516 = vmatpush3.bf16.msra.mxu1 %v2195_v55  ;;  %v968_v10 = vadd.s32 48, %v2272_v46  ;;  %v977_v6 = vadd.s32 120, %v2272_v46 }
 0x22e   : > { %1509 = vmatprep.subr.bf16.mxu1 %v787_v53  ;;  %vm992_vm12 = vcmp.le.s32.totalorder %v2275_v48, %v974_v0  ;;  %vm987_vm13 = vcmp.le.s32.totalorder %v2275_v48, %v969_v18  ;;  %vm994_vm14 = vcmp.le.s32.totalorder %v2275_v48, %v976_v45 }
 0x22f   : > { %vm986_vm5 = vcmp.le.s32.totalorder %v2275_v48, %v968_v10 }
 0x231   : > { %1517 = vmatpush3.bf16.msra.mxu1 %v787_v53 }
 0x232   : > { %1510 = vmatprep.subr.bf16.mxu1 %v786_v60 }
 0x234   : > { %1467 = vmatmul.mubr.msk.bf16.gmra.mxu1 %vm815_vm0, %v2496_v32 }
 0x235   : > { %1470 = vmatprep.mubr.msk.bf16.mxu1 %vm815_vm0, %v2497_v33  ;;  %1518 = vmatpush3.bf16.msra.mxu1 %v786_v60  ;;  %v975_v60 = vadd.s32 104, %v2272_v46 }
 0x236   : > { %1511 = vmatprep.subr.bf16.mxu1 %v785_v29 }
 0x237   : > { %vm993_vm15 = vcmp.le.s32.totalorder %v2275_v48, %v975_v60 }
 0x239   : > { %1519 = vmatpush3.bf16.msra.mxu1 %v785_v29 }
 0x23a   : > { %1512 = vmatprep.subr.bf16.mxu1 %v2114_v38 }
 0x23c   : > { %1471 = vmatmul.mubr.msk.bf16.gmra.mxu1 %vm815_vm0, %v774_v31 }
 0x23d   : > { %1520 = vmatpush3.bf16.msra.mxu1 %v2114_v38  ;;  %v963_v38 = vadd.s32 8, %v2272_v46 }
 0x23e   : > { %1513 = vmatprep.subr.bf16.mxu1 %v2095_v22 }
 0x23f   : > { %vm981_vm4 = vcmp.le.s32.totalorder %v2275_v48, %v963_v38 }
 0x241   : > { %1521 = vmatpush3.bf16.msra.mxu1 %v2095_v22 }
 0x2e4   : > { %v1460_v56 = vpop.f32.mrf.mxu1 }
 0x2e5   : > { %v2282_v59 = vsel %vm982_vm1, %v1460_v56, -inf  ;;  %vm995_vm1 = vcmp.le.s32.totalorder %v2275_v48, %v977_v6 }
 0x2e6   : > { %1016 = vmax.xlane.f32.xlu1 %v2282_v59  ;;  %v898_v22 = vpop.f32.mrf.mxu1 }
 0x2e7   : > { %v2285_v5 = vsel %vm980_vm2, %v898_v22, -inf }
 0x2e8   : > { %1012 = vmax.xlane.f32.xlu0 %v2285_v5  ;;  %v1461_v7 = vpop.f32.mrf.mxu1 }
 0x2e9   : > { %v2291_v24 = vsel %vm983_vm3, %v1461_v7, -inf }
 0x2ea   : > { %v901_v21 = vpop.f32.mrf.mxu1 }
 0x2eb   : > { %v2293_v58 = vsel %vm981_vm4, %v901_v21, -inf }
 0x2ec   : > { %1018 = vmax.xlane.f32.xlu0 %v2291_v24  ;;  %1014 = vmax.xlane.f32.xlu1 %v2293_v58  ;;  %v1464_v63 = vpop.f32.mrf.mxu1 }
 0x2ed   : > { %v2300_v14 = vsel %vm986_vm5, %v1464_v63, -inf }
 0x2ee   : > { %v914_v1 = vpop.f32.mrf.mxu1 }
 0x2ef   : > { %v2307_v26 = vsel %vm984_vm6, %v914_v1, -inf }
 0x2f0   : > { %1024 = vmax.xlane.f32.xlu1 %v2300_v14  ;;  %v1465_v17 = vpop.f32.mrf.mxu1 }
 0x2f1   : > { %v2341_v23 = vsel %vm987_vm13, %v1465_v17, -inf }
 0x2f2   : > { %v917_v25 = vpop.f32.mrf.mxu1 }
 0x2f3   : > { %v2309_v34 = vsel %vm985_vm7, %v917_v25, -inf }
 0x2f4   : > { %1020 = vmax.xlane.f32.xlu1 %v2307_v26  ;;  %1022 = vmax.xlane.f32.xlu0 %v2309_v34  ;;  %v1468_v40 = vpop.f32.mrf.mxu1 }
 0x2f5   : > { %v2316_v8 = vsel %vm990_vm8, %v1468_v40, -inf }
 0x2f6   : > { %v930_v31 = vpop.f32.mrf.mxu1 }
 0x2f7   : > { %v2318_v9 = vsel %vm988_vm9, %v930_v31, -inf }
 0x2f8   : > { %1032 = vmax.xlane.f32.xlu1 %v2316_v8  ;;  %1028 = vmax.xlane.f32.xlu0 %v2318_v9  ;;  %v1469_v13 = vpop.f32.mrf.mxu1 }
 0x2f9   : > { %v2325_v30 = vsel %vm991_vm10, %v1469_v13, -inf }
 0x2fa   : > { %v933_v4 = vpop.f32.mrf.mxu1 }
 0x2fb   : > { %v2332_v53 = vsel %vm989_vm11, %v933_v4, -inf }
 0x2fc   : > { %1034 = vmax.xlane.f32.xlu0 %v2325_v30  ;;  %v1472_v55 = vpop.f32.mrf.mxu1 }
 0x2fd   : > { %v2343_v29 = vsel %vm994_vm14, %v1472_v55, -inf }
 0x2fe   : > { %v946_v51 = vpop.f32.mrf.mxu1 }
 0x2ff   : > { %v2334_v36 = vsel %vm992_vm12, %v946_v51, -inf }
 0x300   : > { %1030 = vmax.xlane.f32.xlu0 %v2332_v53  ;;  %1036 = vmax.xlane.f32.xlu1 %v2334_v36  ;;  %v1473_v28 = vpop.f32.mrf.mxu1 }
 0x301   : > { %v2353_v20 = vsel %vm995_vm1, %v1473_v28, -inf }
 0x302   : > { %v949_v12 = vpop.f32.mrf.mxu1 }
 0x303   : > { %v2349_v3 = vsel %vm993_vm15, %v949_v12, -inf }
 0x304   : > { %1026 = vmax.xlane.f32.xlu0 %v2341_v23  ;;  %1040 = vmax.xlane.f32.xlu1 %v2343_v29 }
 0x308   : > { %1038 = vmax.xlane.f32.xlu0 %v2349_v3 }
 0x30c   : > { %1042 = vmax.xlane.f32.xlu0 %v2353_v20 }
 0x36f   : > { %v1017_v39 = vpop.xlane.xlu1 %1016 }
 0x370   : > { %v1046_v44 = vsub.f32 %v2282_v59, %v1017_v39 }
 0x371   : > { %v1013_v49 = vpop.xlane.xlu0 %1012 }
 0x372   : > { %v1064_v54 = vmul.f32 1.442695, %v1046_v44  ;;  %v1044_v2 = vsub.f32 %v2285_v5, %v1013_v49 }
 0x374   : > { %1648 = vpow2.f32 %v1064_v54  ;;  %v1060_v11 = vmul.f32 1.442695, %v1044_v2 }
 0x375   : > { %v1019_v27 = vpop.xlane.xlu0 %1018  ;;  %v1015_v35 = vpop.xlane.xlu1 %1014 }
 0x376   : > { %v1047_v42 = vsub.f32 %v2291_v24, %v1019_v27  ;;  %v1045_v50 = vsub.f32 %v2293_v58, %v1015_v35  ;;  %1650 = vpow2.f32 %v1060_v11 }
 0x378   : > { %v1066_v15 = vmul.f32 1.442695, %v1047_v42  ;;  %v1062_v32 = vmul.f32 1.442695, %v1045_v50 }
 0x379   : > { %v1025_v16 = vpop.xlane.xlu1 %1024 }
 0x37a   : > { %1652 = vpow2.f32 %v1066_v15  ;;  %v1050_v21 = vsub.f32 %v2300_v14, %v1025_v16 }
 0x37b   : > { %1654 = vpow2.f32 %v1062_v32 }
 0x37c   : > { %v1072_v1 = vmul.f32 1.442695, %v1050_v21 }
 0x37d   : > { %v1021_v33 = vpop.xlane.xlu1 %1020  ;;  %v1023_v37 = vpop.xlane.xlu0 %1022 }
 0x37e   : > { %v1048_v46 = vsub.f32 %v2307_v26, %v1021_v33  ;;  %v1049_v47 = vsub.f32 %v2309_v34, %v1023_v37 }
 0x380   : > { %v1068_v48 = vmul.f32 1.442695, %v1048_v46  ;;  %v1070_v56 = vmul.f32 1.442695, %v1049_v47 }
 0x381   : > { %v2362_v57 = vpop.eup %1648  ;;  %v1033_v38 = vpop.xlane.xlu1 %1032 }
 0x382   : > { %v1029_v59 = vpop.xlane.xlu0 %1028  ;;  %1656 = vpow2.f32 %v1068_v48  ;;  %v1054_v22 = vsub.f32 %v2316_v8, %v1033_v38  ;;  %1096 = vadd.xlane.f32.xlu1 %v2362_v57 }
 0x383   : > { %v1052_v5 = vsub.f32 %v2318_v9, %v1029_v59  ;;  %1658 = vpow2.f32 %v1070_v56  ;;  %v2367_v10 = vpop.eup %1650 }
 0x384   : > { %v1080_v7 = vmul.f32 1.442695, %v1054_v22 }
 0x385   : > { %v1076_v24 = vmul.f32 1.442695, %v1052_v5 }
 0x386   : > { %v1035_v58 = vpop.xlane.xlu0 %1034  ;;  %1660 = vpow2.f32 %v1080_v7  ;;  %1092 = vadd.xlane.f32.xlu1 %v2367_v10 }
 0x387   : > { %v1055_v63 = vsub.f32 %v2325_v30, %v1035_v58  ;;  %v2372_v62 = vpop.eup %1652  ;;  %1662 = vpow2.f32 %v1076_v24 }
 0x388   : > { %1098 = vadd.xlane.f32.xlu0 %v2372_v62  ;;  %v2377_v25 = vpop.eup %1654 }
 0x389   : > { %v1082_v61 = vmul.f32 1.442695, %v1055_v63  ;;  %v1037_v41 = vpop.xlane.xlu1 %1036 }
 0x38a   : > { %v1031_v17 = vpop.xlane.xlu0 %1030  ;;  %v1056_v14 = vsub.f32 %v2334_v36, %v1037_v41 }
 0x38b   : > { %1664 = vpow2.f32 %v1082_v61  ;;  %v1053_v43 = vsub.f32 %v2332_v53, %v1031_v17 }
 0x38c   : > { %1094 = vadd.xlane.f32.xlu0 %v2377_v25  ;;  %1666 = vpow2.f32 %v1072_v1  ;;  %v1084_v34 = vmul.f32 1.442695, %v1056_v14 }
 0x38d   : > { %v1078_v26 = vmul.f32 1.442695, %v1053_v43  ;;  %v1041_v52 = vpop.xlane.xlu1 %1040 }
 0x38e   : > { %v1027_v40 = vpop.xlane.xlu0 %1026  ;;  %v1058_v8 = vsub.f32 %v2343_v29, %v1041_v52 }
 0x38f   : > { %1668 = vpow2.f32 %v1078_v26  ;;  %v1051_v31 = vsub.f32 %v2341_v23, %v1027_v40  ;;  %v2382_v9 = vpop.eup %1656 }
 0x390   : > { %v2384_v13 = vpop.eup %1658  ;;  %1100 = vadd.xlane.f32.xlu1 %v2382_v9  ;;  %1670 = vpow2.f32 %v1084_v34  ;;  %v1088_v0 = vmul.f32 1.442695, %v1058_v8 }
 0x391   : > { %v1074_v19 = vmul.f32 1.442695, %v1051_v31  ;;  %1102 = vadd.xlane.f32.xlu0 %v2384_v13 }
 0x392   : > { %v1039_v4 = vpop.xlane.xlu0 %1038 }
 0x393   : > { %1672 = vpow2.f32 %v1074_v19  ;;  %v1057_v30 = vsub.f32 %v2349_v3, %v1039_v4  ;;  %v2389_v55 = vpop.eup %1660 }
 0x394   : > { %1112 = vadd.xlane.f32.xlu1 %v2389_v55  ;;  %1674 = vpow2.f32 %v1088_v0  ;;  %v2392_v51 = vpop.eup %1662 }
 0x395   : > { %v1086_v18 = vmul.f32 1.442695, %v1057_v30 }
 0x396   : > { %v1043_v45 = vpop.xlane.xlu0 %1042 }
 0x397   : > { %1676 = vpow2.f32 %v1086_v18  ;;  %v1059_v53 = vsub.f32 %v2353_v20, %v1043_v45 }
 0x398   : > { %v2395_v36 = vpop.eup %1664  ;;  %1108 = vadd.xlane.f32.xlu1 %v2392_v51 }
 0x399   : > { %v1090_v28 = vmul.f32 1.442695, %v1059_v53  ;;  %1114 = vadd.xlane.f32.xlu0 %v2395_v36  ;;  %v2399_v60 = vpop.eup %1666 }
 0x39b   : > { %1678 = vpow2.f32 %v1090_v28 }
 0x39c   : > { %v2401_v23 = vpop.eup %1668  ;;  %1104 = vadd.xlane.f32.xlu1 %v2399_v60 }
 0x39d   : > { %1110 = vadd.xlane.f32.xlu0 %v2401_v23  ;;  %v2405_v29 = vpop.eup %1670 }
 0x3a0   : > { %v2407_v12 = vpop.eup %1672  ;;  %1116 = vadd.xlane.f32.xlu1 %v2405_v29 }
 0x3a1   : > { %1106 = vadd.xlane.f32.xlu0 %v2407_v12  ;;  %v2411_v6 = vpop.eup %1674 }
 0x3a4   : > { %v2413_v3 = vpop.eup %1676  ;;  %1120 = vadd.xlane.f32.xlu1 %v2411_v6 }
 0x3a5   : > { %1118 = vadd.xlane.f32.xlu0 %v2413_v3 }
 0x3a8   : > { %v2417_v20 = vpop.eup %1678 }
 0x3a9   : > { %1122 = vadd.xlane.f32.xlu0 %v2417_v20 }
 0x40b   : > { %v1097_v39 = vpop.xlane.xlu1 %1096 }
 0x40f   : > { %v1093_v44 = vpop.xlane.xlu1 %1092 }
 0x411   : > { %v1099_v49 = vpop.xlane.xlu0 %1098 }
 0x412   : > { %1680 = vrcp.f32 %v1099_v49 }
 0x413   : > { %1682 = vrcp.f32 %v1093_v44 }
 0x414   : > { %1684 = vrcp.f32 %v1097_v39 }
 0x415   : > { %v1095_v54 = vpop.xlane.xlu0 %1094 }
 0x416   : > { %1686 = vrcp.f32 %v1095_v54 }
 0x419   : > { %v1101_v2 = vpop.xlane.xlu1 %1100 }
 0x41a   : > { %1688 = vrcp.f32 %v1101_v2  ;;  %v1103_v11 = vpop.xlane.xlu0 %1102 }
 0x41b   : > { %1690 = vrcp.f32 %v1103_v11 }
 0x41d   : > { %v1113_v27 = vpop.xlane.xlu1 %1112 }
 0x41f   : > { %v1681_v35 = vpop.eup %1680 }
 0x420   : > { %v1683_v42 = vpop.eup %1682  ;;  %v1143_v33 = vmul.f32 %v1681_v35, %v2372_v62 }
 0x421   : > { %v1109_v50 = vpop.xlane.xlu1 %1108  ;;  %v1685_v16 = vpop.eup %1684  ;;  %v1140_v37 = vmul.f32 %v1683_v42, %v2367_v10 }
 0x422   : > { %v1115_v15 = vpop.xlane.xlu0 %1114  ;;  %v1142_v56 = vmul.f32 %v1685_v16, %v2362_v57 }
 0x423   : > { %v1687_v32 = vpop.eup %1686  ;;  %1692 = vrcp.f32 %v1115_v15 }
 0x424   : > { %v1141_v46 = vmul.f32 %v1687_v32, %v2377_v25  ;;  %1694 = vrcp.f32 %v1109_v50  ;;  %v1157_v22 = vpack.c.bf16 %v1143_v33, %v1142_v56 }
 0x425   : > { %v1105_v47 = vpop.xlane.xlu1 %1104  ;;  %1696 = vrcp.f32 %v1113_v27 }
 0x426   : > { %v1111_v48 = vpop.xlane.xlu0 %1110  ;;  %v1156_v38 = vpack.c.bf16 %v1141_v46, %v1140_v37 }
 0x427   : > { %v1689_v59 = vpop.eup %1688  ;;  %1698 = vrcp.f32 %v1111_v48 }
 0x428   : > { %v1691_v5 = vpop.eup %1690  ;;  %1490 = vmatprep.mubr.bf16.mxu0 %v1156_v38  ;;  %v1144_v7 = vmul.f32 %v1689_v59, %v2382_v9  ;;  %1700 = vrcp.f32 %v1105_v47 }
 0x429   : > { %v1117_v21 = vpop.xlane.xlu1 %1116  ;;  %1491 = vmatmul.mubr.bf16.vlgmr.msra.gmra.mxu0 %v1157_v22  ;;  %v1145_v10 = vmul.f32 %v1691_v5, %v2384_v13 }
 0x42a   : > { %v1107_v24 = vpop.xlane.xlu0 %1106 }
 0x42b   : > { %1702 = vrcp.f32 %v1107_v24  ;;  %v1158_v58 = vpack.c.bf16 %v1145_v10, %v1144_v7 }
 0x42c   : > { %1704 = vrcp.f32 %v1117_v21 }
 0x42d   : > { %1494 = vmatprep.mubr.bf16.mxu0 %v1158_v58  ;;  %v1121_v57 = vpop.xlane.xlu1 %1120 }
 0x42e   : > { %v1119_v63 = vpop.xlane.xlu0 %1118 }
 0x42f   : > { %1706 = vrcp.f32 %v1119_v63 }
 0x430   : > { %1708 = vrcp.f32 %v1121_v57  ;;  %v1693_v62 = vpop.eup %1692 }
 0x431   : > { %v1695_v1 = vpop.eup %1694  ;;  %v1151_v43 = vmul.f32 %v1693_v62, %v2395_v36 }
 0x432   : > { %v1123_v61 = vpop.xlane.xlu0 %1122  ;;  %v1697_v17 = vpop.eup %1696  ;;  %v1148_v14 = vmul.f32 %v1695_v1, %v2392_v51 }
 0x433   : > { %1710 = vrcp.f32 %v1123_v61  ;;  %v1150_v34 = vmul.f32 %v1697_v17, %v2389_v55 }
 0x434   : > { %v1699_v41 = vpop.eup %1698 }
 0x435   : > { %v1149_v25 = vmul.f32 %v1699_v41, %v2401_v23  ;;  %v1701_v26 = vpop.eup %1700  ;;  %v1161_v31 = vpack.c.bf16 %v1151_v43, %v1150_v34 }
 0x436   : > { %v1146_v8 = vmul.f32 %v1701_v26, %v2399_v60 }
 0x437   : > { %v1160_v40 = vpack.c.bf16 %v1149_v25, %v1148_v14 }
 0x438   : > { %v1703_v52 = vpop.eup %1702 }
 0x439   : > { %1498 = vmatprep.mubr.bf16.mxu1 %v1160_v40  ;;  %v1147_v9 = vmul.f32 %v1703_v52, %v2407_v12  ;;  %v1705_v13 = vpop.eup %1704 }
 0x43a   : > { %1499 = vmatmul.mubr.bf16.vlgmr.msra.gmra.mxu1 %v1161_v31  ;;  %v1152_v30 = vmul.f32 %v1705_v13, %v2405_v29 }
 0x43b   : > { %v1159_v19 = vpack.c.bf16 %v1147_v9, %v1146_v8 }
 0x43c   : > { %v1707_v0 = vpop.eup %1706 }
 0x43d   : > { %v1709_v4 = vpop.eup %1708  ;;  %1495 = vmatmul.mubr.bf16.gmra.mxu0 %v1159_v19  ;;  %v1153_v55 = vmul.f32 %v1707_v0, %v2413_v3 }
 0x43e   : > { %v1154_v51 = vmul.f32 %v1709_v4, %v2411_v6 }
 0x43f   : > { %v1162_v45 = vpack.c.bf16 %v1153_v55, %v1152_v30 }
 0x440   : > { %v1711_v18 = vpop.eup %1710 }
 0x441   : > { %v1155_v53 = vmul.f32 %v1711_v18, %v2417_v20  ;;  %1502 = vmatprep.mubr.bf16.mxu1 %v1162_v45 }
 0x443   : > { %v1163_v36 = vpack.c.bf16 %v1155_v53, %v1154_v51 }
 0x445   : > { %1503 = vmatmul.mubr.bf16.gmra.mxu1 %v1163_v36 }
 0x4e9   : > { %v1492_v28 = vpop.f32.mrf.mxu0 }
 0x4ea   : > { %1263 = vst.msk [vmem:[%s2441_s5 + $0x10] sm:$0xff] %vm815_vm0, %v1492_v28 }
 0x4eb   : > { %v1198_v60 = vpop.f32.mrf.mxu0 }
 0x4ec   : > { %1261 = vst.msk [vmem:[%s2441_s5] sm:$0xff] %vm815_vm0, %v1198_v60 }
 0x4ed   : > { %v1493_v23 = vpop.f32.mrf.mxu0 }
 0x4ee   : > { %1264 = vst.msk [vmem:[%s2441_s5 + $0x18] sm:$0xff] %vm815_vm0, %v1493_v23 }
 0x4ef   : > { %v1201_v29 = vpop.f32.mrf.mxu0 }
 0x4f0   : > { %1262 = vst.msk [vmem:[%s2441_s5 + $0x8] sm:$0xff] %vm815_vm0, %v1201_v29 }
 0x4fa   : > { %v1500_v12 = vpop.f32.mrf.mxu1 }
 0x4fb   : > { %1271 = vst.msk [vmem:[%s2441_s5 + $0x50] sm:$0xff] %vm815_vm0, %v1500_v12 }
 0x4fc   : > { %v1230_v6 = vpop.f32.mrf.mxu1 }
 0x4fd   : > { %1269 = vst.msk [vmem:[%s2441_s5 + $0x40] sm:$0xff] %vm815_vm0, %v1230_v6  ;;  %v1496_v3 = vpop.f32.mrf.mxu0 }
 0x4fe   : > { %1267 = vst.msk [vmem:[%s2441_s5 + $0x30] sm:$0xff] %vm815_vm0, %v1496_v3  ;;  %v1501_v20 = vpop.f32.mrf.mxu1 }
 0x4ff   : > { %1272 = vst.msk [vmem:[%s2441_s5 + $0x58] sm:$0xff] %vm815_vm0, %v1501_v20  ;;  %v1214_v39 = vpop.f32.mrf.mxu0 }
 0x500   : > { %1265 = vst.msk [vmem:[%s2441_s5 + $0x20] sm:$0xff] %vm815_vm0, %v1214_v39  ;;  %v1233_v44 = vpop.f32.mrf.mxu1 }
 0x501   : > { %1270 = vst.msk [vmem:[%s2441_s5 + $0x48] sm:$0xff] %vm815_vm0, %v1233_v44  ;;  %v1497_v49 = vpop.f32.mrf.mxu0 }
 0x502   : > { %1268 = vst.msk [vmem:[%s2441_s5 + $0x38] sm:$0xff] %vm815_vm0, %v1497_v49 }
 0x503   : > { %v1217_v54 = vpop.f32.mrf.mxu0 }
 0x504   : > { %1266 = vst.msk [vmem:[%s2441_s5 + $0x28] sm:$0xff] %vm815_vm0, %v1217_v54 }
 0x505   : > { %v1504_v2 = vpop.f32.mrf.mxu1 }
 0x506   : > { %1275 = vst.msk [vmem:[%s2441_s5 + $0x70] sm:$0xff] %vm815_vm0, %v1504_v2 }
 0x507   : > { %v1246_v11 = vpop.f32.mrf.mxu1 }
 0x508   : > { %1273 = vst.msk [vmem:[%s2441_s5 + $0x60] sm:$0xff] %vm815_vm0, %v1246_v11 }
 0x509   : > { %v1505_v27 = vpop.f32.mrf.mxu1 }
 0x50a   : > { %1276 = vst.msk [vmem:[%s2441_s5 + $0x78] sm:$0xff] %vm815_vm0, %v1505_v27 }
 0x50b   : > { %v1249_v35 = vpop.f32.mrf.mxu1 }
 0x50c   : > { %1274 = vst.msk [vmem:[%s2441_s5 + $0x68] sm:$0xff] %vm815_vm0, %v1249_v35 }
 0x50d PF: > { %p12_p9 = scmp.ge.s32.totalorder %s1818_s14, 4   ;;  %s2498_s9 = smov %s1766_s10 }
 0x50e   : > { %s2499_s10 = smov %s1770_s11  ;;  %s2500_s11 = smov %s1828_s17 }
 0x50f   : > { %s2501_s12 = smov %s1818_s14  ;;  %14 = sbr.rel (!%p12_p9) target bundleno = 3 (0x3), region = 68 }
 0x514   :  { %1298 = vsyncpa [#allocation3], 1 }
 0x515   :  { %1300 = vsyncpa [#allocation3 + $0x1], 1 }

</bundles_post_ra>
